<compile_context>
chip_gen: v6e
topology: v6e:2x2x1
jax: 0.10.0
libtpu: 0.0.40
codegen_flags: <defaults>
</compile_context>

<pallas_src>
import jax
import jax.numpy as jnp
from jax.experimental import pallas as pl
from jax.experimental.pallas import tpu as pltpu

BN_EPS = 1e-5
TILE_M = 8192   # pass-1 lane tile per core-half (sweepable 4096..32768)
TILE_S = 8192   # pass-2 per-image spatial lane tile
LANE = 128


def _cdiv(a, b):
    return -(-a // b)


def _round_up(a, b):
    return _cdiv(a, b) * b


def _conv_stats_kernel(p_ref, w_ref, y_ref, ssum_ref, ssq_ref):
    # p_ref:    [K, TM]    bf16 im2col patches (transposed, M lane-dense)
    # w_ref:    [Cout, K]  bf16 flattened conv weight
    # y_ref:    [Cout, TM] bf16 conv output tile (staging buffer between passes)
    # ssum_ref: [Cout, 1]  f32 resident per-core-half accumulator
    # ssq_ref:  [Cout, 1]  f32 resident per-core-half accumulator
    y = jnp.dot(w_ref[...], p_ref[...], preferred_element_type=jnp.float32)
    y_ref[...] = y.astype(y_ref.dtype)

    @pl.when(pl.program_id(1) == 0)
    def _init():
        ssum_ref[...] = jnp.zeros_like(ssum_ref)
        ssq_ref[...] = jnp.zeros_like(ssq_ref)

    # Exact global BN stats: zero-padded M columns give y == 0 (no bias added),
    # so they contribute nothing to either accumulator.
    ssum_ref[...] += jnp.sum(y, axis=1, keepdims=True)
    ssq_ref[...] += jnp.sum(y * y, axis=1, keepdims=True)


def _bn_relu_kernel(y_ref, scale_ref, shift_ref, o_ref):
    # y_ref: [Cout, TS] bf16; scale/shift: [Cout, 1] f32; o_ref: [Cout, TS] f32
    y = y_ref[...].astype(jnp.float32)
    o_ref[...] = jnp.maximum(y * scale_ref[...] + shift_ref[...], 0.0)


def _im2col_t(x_nchw, k=3, dilation=3, stride=2, pad=3):
    """Dilated/strided 3x3 patches, transposed: [Cin*k*k, N, Ho*Wo], plus Ho, Wo."""
    N, C, H, W = x_nchw.shape
    xp = jnp.pad(x_nchw, ((0, 0), (0, 0), (pad, pad), (pad, pad)))
    Ho = (H + 2 * pad - dilation * (k - 1) - 1) // stride + 1
    Wo = (W + 2 * pad - dilation * (k - 1) - 1) // stride + 1
    taps = []
    for kh in range(k):
        for kw in range(k):
            taps.append(
                xp[:, :,
                   kh * dilation: kh * dilation + stride * (Ho - 1) + 1: stride,
                   kw * dilation: kw * dilation + stride * (Wo - 1) + 1: stride])
    p = jnp.stack(taps, axis=0)          # [k*k, N, C, Ho, Wo]
    p = p.transpose(2, 0, 1, 3, 4)       # [C, k*k, N, Ho, Wo]  (K order = (cin,kh,kw))
    return p.reshape(C * k * k, N, Ho * Wo), Ho, Wo


@jax.jit
def double_conv2_1(x_nchw, conv_w, conv_b, bn_gamma, bn_beta):
    """x_nchw: [N,Cin,H,W]; conv_w: [Cout,Cin,3,3]; returns [N,Cout,Ho,Wo] (f32)."""
    del conv_b  # per-channel constant: exactly cancelled by train-mode BN mean subtraction
    N, Cin, H, W = x_nchw.shape
    Cout = conv_w.shape[0]
    K = Cin * 9

    # bf16 patches halve HBM traffic of the dominant operand; MXU accumulates in f32.
    pt, Ho, Wo = _im2col_t(x_nchw.astype(jnp.bfloat16))      # [K, N, S]
    S = Ho * Wo
    M = N * S            # true per-channel element count for BN statistics

    # --- Pass-2 spatial tiling: per-image, lane-dense, tile multiple of 128 -----
    st = _cdiv(S, TILE_S)                    # spatial tiles per image
    ts = _round_up(_cdiv(S, st), LANE)       # tile size (multiple of 128 lanes)
    S_pad = st * ts                          # per-image padded spatial extent

    # --- Pass-1 flat-M tiling, split in two halves (one per v7x TensorCore) ----
    Mp = N * S_pad
    mt_half = _cdiv(Mp, 2 * TILE_M)          # M tiles per core-half
    tm = _round_up(_cdiv(Mp, 2 * mt_half), LANE)
    Mp2 = 2 * tm * mt_half                   # padded flat extent (>= Mp)

    pt = jnp.pad(pt, ((0, 0), (0, 0), (0, S_pad - S))).reshape(K, Mp)
    if Mp2 != Mp:
        pt = jnp.pad(pt, ((0, 0), (0, Mp2 - Mp)))

    w_mat = conv_w.reshape(Cout, K).astype(jnp.bfloat16)     # K order = (cin,kh,kw)

    # ---- Pass 1: conv matmul + per-channel, per-core-half sum / sum-of-squares --
    y_t, ssum, ssq = pl.pallas_call(
        _conv_stats_kernel,
        out_shape=(
            jax.ShapeDtypeStruct((Cout, Mp2), jnp.bfloat16),   # bf16 staging buffer
            jax.ShapeDtypeStruct((2, Cout, 1), jnp.float32),   # per-half partial sums
            jax.ShapeDtypeStruct((2, Cout, 1), jnp.float32),
        ),
        grid=(2, mt_half),
        in_specs=[
            pl.BlockSpec((K, tm), lambda c, m: (0, c * mt_half + m)),
            pl.BlockSpec((Cout, K), lambda c, m: (0, 0)),
        ],
        out_specs=(
            pl.BlockSpec((Cout, tm), lambda c, m: (0, c * mt_half + m)),
            pl.BlockSpec((None, Cout, 1), lambda c, m: (c, 0, 0)),
            pl.BlockSpec((None, Cout, 1), lambda c, m: (c, 0, 0)),
        ),
        compiler_params=pltpu.CompilerParams(
            # Half-split axis shards across v7x's two TCs; stat accumulation over
            # M tiles stays "arbitrary" (resident accumulator, no race).
            dimension_semantics=("parallel", "arbitrary"),
            vmem_limit_bytes=32 * 1024 * 1024),
        cost_estimate=pl.CostEstimate(
            flops=2 * Mp2 * K * Cout + 4 * Mp2 * Cout,
            transcendentals=0,
            bytes_accessed=(K * Mp2 * 2 + Cout * K * 2
                            + Cout * Mp2 * 2 + 4 * Cout * 4),
        ),
    )(pt, w_mat)

    # ---- Fold BN stats into per-channel scale/shift (tiny, f32) -----------------
    # NOTE: E[x^2]-E[x]^2 is cancellation-prone for huge M; guarded with max(.,0).
    total_sum = jnp.sum(ssum[:, :, 0], axis=0)     # reduce the two core-half partials
    total_ssq = jnp.sum(ssq[:, :, 0], axis=0)
    mean = total_sum / M
    var = jnp.maximum(total_ssq / M - mean * mean, 0.0)
    inv_std = jax.lax.rsqrt(var + BN_EPS)
    g = bn_gamma.astype(jnp.float32)
    b = bn_beta.astype(jnp.float32)
    scale = (g * inv_std).reshape(Cout, 1)
    shift = (b - mean * g * inv_std).reshape(Cout, 1)

    # ---- Pass 2: normalize + ReLU, writing straight into (N, Cout, S_pad) -------
    # No trailing XLA transpose: the out BlockSpec places each image's channel-major
    # spatial tile directly.  Per-image spatial padding columns are sliced off below.
    out_p = pl.pallas_call(
        _bn_relu_kernel,
        out_shape=jax.ShapeDtypeStruct((N, Cout, S_pad), jnp.float32),
        grid=(N, st),
        in_specs=[
            pl.BlockSpec((Cout, ts), lambda n, s: (0, n * st + s)),
            pl.BlockSpec((Cout, 1), lambda n, s: (0, 0)),
            pl.BlockSpec((Cout, 1), lambda n, s: (0, 0)),
        ],
        out_specs=pl.BlockSpec((None, Cout, ts), lambda n, s: (n, 0, s)),
        compiler_params=pltpu.CompilerParams(
            dimension_semantics=("parallel", "parallel")),
        cost_estimate=pl.CostEstimate(
            flops=2 * N * S_pad * Cout,
            transcendentals=0,
            bytes_accessed=Cout * N * S_pad * (2 + 4) + 4 * Cout * 4,
        ),
    )(y_t, scale, shift)

    out = out_p[:, :, :S].reshape(N, Cout, Ho, Wo)
    return out


if __name__ == "__main__":
    key = jax.random.PRNGKey(0)
    k_x, k_w, k_b = jax.random.split(key, 3)

    N, Cin, H, W = 2, 4, 16, 16
    Cout = 8

    x = jax.random.normal(k_x, (N, Cin, H, W), dtype=jnp.float32)

    # Deterministic parameter init (shapes from nn.Conv2d / nn.BatchNorm2d).
    fan_in = Cin * 3 * 3
    bound = 1.0 / (fan_in ** 0.5)
    conv_w = jax.random.uniform(k_w, (Cout, Cin, 3, 3), jnp.float32, -bound, bound)
    conv_b = jax.random.uniform(k_b, (Cout,), jnp.float32, -bound, bound)
    bn_gamma = jnp.ones((Cout,), jnp.float32)   # PyTorch BN init
    bn_beta = jnp.zeros((Cout,), jnp.float32)

    out = double_conv2_1(x, conv_w, conv_b, bn_gamma, bn_beta)
    jax.block_until_ready(out)

    assert out.shape == (N, Cout, 8, 8), out.shape
    assert bool(jnp.all(jnp.isfinite(out))) and bool(jnp.all(out >= 0.0))
    print("KERNEL_OK")
</pallas_src>

<mosaic_0001>
module attributes {stable_mosaic.version = 11 : i64} {
  func.func @_conv_stats_kernel(%arg0: i32, %arg1: i32, %arg2: memref<36x128xbf16, #tpu.memory_space<vmem>>, %arg3: memref<8x36xbf16, #tpu.memory_space<vmem>>, %arg4: memref<8x128xbf16, #tpu.memory_space<vmem>>, %arg5: memref<1x8x1xf32, #tpu.memory_space<vmem>>, %arg6: memref<1x8x1xf32, #tpu.memory_space<vmem>>) attributes {dimension_semantics = [#tpu.dimension_semantics<parallel>, #tpu.dimension_semantics<arbitrary>], iteration_bounds = array<i64: 2, 1>, scalar_prefetch = 0 : i64, scratch_operands = 0 : i64, tpu.core_type = #tpu.core_type<tc>, window_params = [{transform_indices = @transform_0, window_bounds = array<i64: 36, 128>}, {pipeline_mode = #tpu.pipeline_mode<synchronous>, transform_indices = @transform_1, window_bounds = array<i64: 8, 36>}, {transform_indices = @transform_2, window_bounds = array<i64: 8, 128>}, {transform_indices = @transform_3, window_bounds = array<i64: 1, 8, 1>}, {transform_indices = @transform_4, window_bounds = array<i64: 1, 8, 1>}]} {
    %c0 = arith.constant 0 : index
    %c0_0 = arith.constant 0 : index
    %0 = vector.load %arg3[%c0, %c0_0] : memref<8x36xbf16, #tpu.memory_space<vmem>>, vector<8x36xbf16>
    %c0_1 = arith.constant 0 : index
    %c0_2 = arith.constant 0 : index
    %1 = vector.load %arg2[%c0_1, %c0_2] : memref<36x128xbf16, #tpu.memory_space<vmem>>, vector<36x128xbf16>
    %cst = arith.constant dense<0.000000e+00> : vector<8x128xf32>
    %2 = tpu.matmul %0, %1, %cst {dimension_numbers = #tpu.dot_dimension_numbers<[1], [0], [0], [1], [0, 0, 1, 1], [], []>} : vector<8x36xbf16>, vector<36x128xbf16>, vector<8x128xf32> -> vector<8x128xf32>
    %3 = arith.truncf %2 : vector<8x128xf32> to vector<8x128xbf16>
    %c0_3 = arith.constant 0 : index
    %c0_4 = arith.constant 0 : index
    %4 = vector.load %arg4[%c0_3, %c0_4] : memref<8x128xbf16, #tpu.memory_space<vmem>>, vector<8x128xbf16>
    tpu.vector_store %arg4[%c0_3, %c0_4], %3 {strides = array<i32>} : memref<8x128xbf16, #tpu.memory_space<vmem>>, vector<8x128xbf16>,
    %c0_i32 = arith.constant 0 : i32
    %5 = arith.cmpi eq, %arg1, %c0_i32 : i32
    %6 = arith.extui %5 : i1 to i32
    %c0_i32_5 = arith.constant 0 : i32
    %7 = arith.cmpi ne, %6, %c0_i32_5 : i32
    scf.if %7 {
      %cst_20 = arith.constant 0.000000e+00 : f32
      %25 = vector.broadcast %cst_20 : f32 to vector<8x1xf32>
      %c0_21 = arith.constant 0 : index
      %c0_22 = arith.constant 0 : index
      %c0_23 = arith.constant 0 : index
      %26 = vector.load %arg5[%c0_21, %c0_22, %c0_23] : memref<1x8x1xf32, #tpu.memory_space<vmem>>, vector<1x8x1xf32>
      %27 = vector.shape_cast %26 : vector<1x8x1xf32> to vector<8x1xf32>
      %28 = vector.shape_cast %25 : vector<8x1xf32> to vector<1x8x1xf32>
      tpu.vector_store %arg5[%c0_21, %c0_22, %c0_23], %28 {strides = array<i32>} : memref<1x8x1xf32, #tpu.memory_space<vmem>>, vector<1x8x1xf32>,
      %cst_24 = arith.constant 0.000000e+00 : f32
      %29 = vector.broadcast %cst_24 : f32 to vector<8x1xf32>
      %c0_25 = arith.constant 0 : index
      %c0_26 = arith.constant 0 : index
      %c0_27 = arith.constant 0 : index
      %30 = vector.load %arg6[%c0_25, %c0_26, %c0_27] : memref<1x8x1xf32, #tpu.memory_space<vmem>>, vector<1x8x1xf32>
      %31 = vector.shape_cast %30 : vector<1x8x1xf32> to vector<8x1xf32>
      %32 = vector.shape_cast %29 : vector<8x1xf32> to vector<1x8x1xf32>
      tpu.vector_store %arg6[%c0_25, %c0_26, %c0_27], %32 {strides = array<i32>} : memref<1x8x1xf32, #tpu.memory_space<vmem>>, vector<1x8x1xf32>,
    } else {
    }
    %c0_6 = arith.constant 0 : index
    %c0_7 = arith.constant 0 : index
    %c0_8 = arith.constant 0 : index
    %8 = vector.load %arg5[%c0_6, %c0_7, %c0_8] : memref<1x8x1xf32, #tpu.memory_space<vmem>>, vector<1x8x1xf32>
    %9 = vector.shape_cast %8 : vector<1x8x1xf32> to vector<8x1xf32>
    %cst_9 = arith.constant dense<0.000000e+00> : vector<8xf32>
    %10 = vector.multi_reduction <add>, %2, %cst_9 [1] : vector<8x128xf32> to vector<8xf32>
    %11 = vector.shape_cast %10 : vector<8xf32> to vector<8x1xf32>
    %12 = arith.addf %9, %11 : vector<8x1xf32>
    %c0_10 = arith.constant 0 : index
    %c0_11 = arith.constant 0 : index
    %c0_12 = arith.constant 0 : index
    %13 = vector.load %arg5[%c0_10, %c0_11, %c0_12] : memref<1x8x1xf32, #tpu.memory_space<vmem>>, vector<1x8x1xf32>
    %14 = vector.shape_cast %13 : vector<1x8x1xf32> to vector<8x1xf32>
    %15 = vector.shape_cast %12 : vector<8x1xf32> to vector<1x8x1xf32>
    tpu.vector_store %arg5[%c0_10, %c0_11, %c0_12], %15 {strides = array<i32>} : memref<1x8x1xf32, #tpu.memory_space<vmem>>, vector<1x8x1xf32>,
    %c0_13 = arith.constant 0 : index
    %c0_14 = arith.constant 0 : index
    %c0_15 = arith.constant 0 : index
    %16 = vector.load %arg6[%c0_13, %c0_14, %c0_15] : memref<1x8x1xf32, #tpu.memory_space<vmem>>, vector<1x8x1xf32>
    %17 = vector.shape_cast %16 : vector<1x8x1xf32> to vector<8x1xf32>
    %18 = arith.mulf %2, %2 : vector<8x128xf32>
    %cst_16 = arith.constant dense<0.000000e+00> : vector<8xf32>
    %19 = vector.multi_reduction <add>, %18, %cst_16 [1] : vector<8x128xf32> to vector<8xf32>
    %20 = vector.shape_cast %19 : vector<8xf32> to vector<8x1xf32>
    %21 = arith.addf %17, %20 : vector<8x1xf32>
    %c0_17 = arith.constant 0 : index
    %c0_18 = arith.constant 0 : index
    %c0_19 = arith.constant 0 : index
    %22 = vector.load %arg6[%c0_17, %c0_18, %c0_19] : memref<1x8x1xf32, #tpu.memory_space<vmem>>, vector<1x8x1xf32>
    %23 = vector.shape_cast %22 : vector<1x8x1xf32> to vector<8x1xf32>
    %24 = vector.shape_cast %21 : vector<8x1xf32> to vector<1x8x1xf32>
    tpu.vector_store %arg6[%c0_17, %c0_18, %c0_19], %24 {strides = array<i32>} : memref<1x8x1xf32, #tpu.memory_space<vmem>>, vector<1x8x1xf32>,
    return
  }
  func.func @transform_0(%arg0: i32, %arg1: i32) -> (i32, i32) {
    %c1_i32 = arith.constant 1 : i32
    %0 = arith.muli %arg0, %c1_i32 : i32
    %1 = arith.addi %0, %arg1 : i32
    %c0_i32 = arith.constant 0 : i32
    %c0_i32_0 = arith.constant 0 : i32
    return %c0_i32, %1 : i32, i32
  }
  func.func @transform_1(%arg0: i32, %arg1: i32) -> (i32, i32) {
    %c0_i32 = arith.constant 0 : i32
    %c0_i32_0 = arith.constant 0 : i32
    %c0_i32_1 = arith.constant 0 : i32
    return %c0_i32, %c0_i32_0 : i32, i32
  }
  func.func @transform_2(%arg0: i32, %arg1: i32) -> (i32, i32) {
    %c1_i32 = arith.constant 1 : i32
    %0 = arith.muli %arg0, %c1_i32 : i32
    %1 = arith.addi %0, %arg1 : i32
    %c0_i32 = arith.constant 0 : i32
    %c0_i32_0 = arith.constant 0 : i32
    return %c0_i32, %1 : i32, i32
  }
  func.func @transform_3(%arg0: i32, %arg1: i32) -> (i32, i32, i32) {
    %c0_i32 = arith.constant 0 : i32
    %c0_i32_0 = arith.constant 0 : i32
    %c0_i32_1 = arith.constant 0 : i32
    return %arg0, %c0_i32, %c0_i32_0 : i32, i32, i32
  }
  func.func @transform_4(%arg0: i32, %arg1: i32) -> (i32, i32, i32) {
    %c0_i32 = arith.constant 0 : i32
    %c0_i32_0 = arith.constant 0 : i32
    %c0_i32_1 = arith.constant 0 : i32
    return %arg0, %c0_i32, %c0_i32_0 : i32, i32, i32
  }
}

module attributes {stable_mosaic.version = 11 : i64} {
  func.func @_bn_relu_kernel(%arg0: i32, %arg1: i32, %arg2: memref<8x128xbf16, #tpu.memory_space<vmem>>, %arg3: memref<8x1xf32, #tpu.memory_space<vmem>>, %arg4: memref<8x1xf32, #tpu.memory_space<vmem>>, %arg5: memref<1x8x128xf32, #tpu.memory_space<vmem>>) attributes {dimension_semantics = [#tpu.dimension_semantics<parallel>, #tpu.dimension_semantics<parallel>], iteration_bounds = array<i64: 2, 1>, scalar_prefetch = 0 : i64, scratch_operands = 0 : i64, tpu.core_type = #tpu.core_type<tc>, window_params = [{transform_indices = @transform_0, window_bounds = array<i64: 8, 128>}, {pipeline_mode = #tpu.pipeline_mode<synchronous>, transform_indices = @transform_1, window_bounds = array<i64: 8, 1>}, {pipeline_mode = #tpu.pipeline_mode<synchronous>, transform_indices = @transform_2, window_bounds = array<i64: 8, 1>}, {transform_indices = @transform_3, window_bounds = array<i64: 1, 8, 128>}]} {
    %c0 = arith.constant 0 : index
    %c0_0 = arith.constant 0 : index
    %0 = vector.load %arg2[%c0, %c0_0] : memref<8x128xbf16, #tpu.memory_space<vmem>>, vector<8x128xbf16>
    %1 = arith.extf %0 : vector<8x128xbf16> to vector<8x128xf32>
    %c0_1 = arith.constant 0 : index
    %c0_2 = arith.constant 0 : index
    %2 = vector.load %arg3[%c0_1, %c0_2] : memref<8x1xf32, #tpu.memory_space<vmem>>, vector<8x1xf32>
    %3 = vector.broadcast %2 : vector<8x1xf32> to vector<8x128xf32>
    %4 = arith.mulf %1, %3 : vector<8x128xf32>
    %c0_3 = arith.constant 0 : index
    %c0_4 = arith.constant 0 : index
    %5 = vector.load %arg4[%c0_3, %c0_4] : memref<8x1xf32, #tpu.memory_space<vmem>>, vector<8x1xf32>
    %6 = vector.broadcast %5 : vector<8x1xf32> to vector<8x128xf32>
    %7 = arith.addf %4, %6 : vector<8x128xf32>
    %cst = arith.constant 0.000000e+00 : f32
    %8 = vector.broadcast %cst : f32 to vector<8x128xf32>
    %9 = arith.maximumf %7, %8 : vector<8x128xf32>
    %c0_5 = arith.constant 0 : index
    %c0_6 = arith.constant 0 : index
    %c0_7 = arith.constant 0 : index
    %10 = vector.load %arg5[%c0_5, %c0_6, %c0_7] : memref<1x8x128xf32, #tpu.memory_space<vmem>>, vector<1x8x128xf32>
    %11 = vector.shape_cast %10 : vector<1x8x128xf32> to vector<8x128xf32>
    %12 = vector.shape_cast %9 : vector<8x128xf32> to vector<1x8x128xf32>
    tpu.vector_store %arg5[%c0_5, %c0_6, %c0_7], %12 {strides = array<i32>} : memref<1x8x128xf32, #tpu.memory_space<vmem>>, vector<1x8x128xf32>,
    return
  }
  func.func @transform_0(%arg0: i32, %arg1: i32) -> (i32, i32) {
    %c1_i32 = arith.constant 1 : i32
    %0 = arith.muli %arg0, %c1_i32 : i32
    %1 = arith.addi %0, %arg1 : i32
    %c0_i32 = arith.constant 0 : i32
    %c0_i32_0 = arith.constant 0 : i32
    return %c0_i32, %1 : i32, i32
  }
  func.func @transform_1(%arg0: i32, %arg1: i32) -> (i32, i32) {
    %c0_i32 = arith.constant 0 : i32
    %c0_i32_0 = arith.constant 0 : i32
    %c0_i32_1 = arith.constant 0 : i32
    return %c0_i32, %c0_i32_0 : i32, i32
  }
  func.func @transform_2(%arg0: i32, %arg1: i32) -> (i32, i32) {
    %c0_i32 = arith.constant 0 : i32
    %c0_i32_0 = arith.constant 0 : i32
    %c0_i32_1 = arith.constant 0 : i32
    return %c0_i32, %c0_i32_0 : i32, i32
  }
  func.func @transform_3(%arg0: i32, %arg1: i32) -> (i32, i32, i32) {
    %c0_i32 = arith.constant 0 : i32
    %c0_i32_0 = arith.constant 0 : i32
    return %arg0, %c0_i32, %arg1 : i32, i32, i32
  }
}

</mosaic_0001>

<bundles_post_ra>
// kernel: double_conv2_1.3
= control target key start
LH: loop header
LB: loop body
LE: loop exit
PB: predicated region body
PF: predicated region fallthrough
CT: control target
= control target key end

     0   :  { %s362_s12 = smov 0   ;;  %s364_s13 = smov 0   ;;  %s398_s0 = inlined_call_operand.vmem [shape: bf16[8,256], index: 0, kind: input, shape index: {}]   ;;  %s399_s1 = inlined_call_operand.vmem [shape: f32[8,1], index: 1, kind: input, shape index: {}]   ;;  %s400_s2 = inlined_call_operand.vmem [shape: f32[8,1], index: 2, kind: input, shape index: {}]   ;;  %s401_s3 = inlined_call_operand.vmem [shape: f32[2,8,128], index: 3, kind: output, shape index: {}]  }
   0x1   :  { %s366_s14 = smov 0  }
   0x2 LB: > { %s25_s15 = sadd.s32 1, %s335_s13  ;;  %p286_p0 = scmp.ge.s32.totalorder %s339_s14, 1  ;;  %s339_s14 = sphi %s366_s14, %s13_s14   ;;  %s335_s13 = sphi %s364_s13, %s403_s13   ;;  %s331_s12 = sphi %s362_s12, %s402_s12  }
   0x3   : > { %p27_p1 = scmp.ge.s32.totalorder %s25_s15, 2  ;;  %p154_p2 = scmp.lt.s32.totalorder %s339_s14, 3 }
   0x5   : > { %s405_s15 = smov (%p27_p1, %s25_s15), 0  ;;  %p155_p3 = pnand %p286_p0, %p154_p2 }
   0x6   : > { %p181_p4 = scmp.lt.s32.totalorder (!%p155_p3), %s331_s12, 1 }
   0x7   : > { %158 = sbr.rel (%p155_p3) target bundleno = 147 (0x93), region = 32 }
   0xc   : > { %v195_v0 = vld [vmem:[%s399_s1] sm:$0xff]  ;;  %v341_v1 = vmov 0   ;;  %s407_s12 = smov (!%p181_p4, %s331_s12), 1 }
   0xd   : > { %316 = vset.pattern.permute.xlu0 %v341_v1  ;;  %v202_v2 = vld [vmem:[%s400_s2] sm:$0xff]  ;;  %s287_s20 = sshll.u32 %s407_s12, 2  ;;  %s288_s24 = sshll.u32 %s407_s12, 3 }
   0xe   : > { %198 = vperm.xlu0 %316, %v195_v0   ;;  %s184_s23 = scalar_lea.vmem %s398_s0, %s287_s20  ;;  %s192_s27 = scalar_lea.vmem %s401_s3, %s288_s24 }
   0xf   : > { %v193_v3 = vld [vmem:[%s184_s23] sm:$0xf] }
  0x10   : > { %v194_v4 = vunpack.c.l.bf16 %v193_v3 }
  0x12   : > { %205 = vperm.xlu0 %316, %v202_v2  }
  0x89   : > { %v199_v5 = vpop.permute.xlu0 %198 }
  0x8a   : > { %v201_v6 = vmul.f32 %v199_v5, %v194_v4 }
  0x8d   : > { %v206_v7 = vpop.permute.xlu0 %205 }
  0x8e   : > { %v208_v8 = vadd.f32 %v206_v7, %v201_v6 }
  0x90   : > { %v209_v9 = vmax.f32 %v208_v8, 0.0 }
  0x92   : > { %210 = vst [vmem:[%s192_s27] sm:$0xff] %v209_v9 }
  0x93 PF: > { %s13_s14 = sadd.s32 1, %s339_s14   ;;  %s402_s12 = smov %s335_s13 }
  0x94   : > { %p10_p5 = scmp.ge.s32.totalorder %s13_s14, 4   ;;  %s403_s13 = smov %s405_s15 }
  0x96   :  { %12 = sbr.rel (!%p10_p5) target bundleno = 2 (0x2), region = 62 }

// kernel: double_conv2_1.2
= control target key start
LH: loop header
LB: loop body
LE: loop exit
PB: predicated region body
PF: predicated region fallthrough
CT: control target
= control target key end

     0   :  { %s665_s15 = smov 0   ;;  %s667_s16 = smov 0   ;;  %s744_s0 = inlined_call_operand.vmem [shape: bf16[36,256], index: 0, kind: input, shape index: {}]   ;;  %s745_s1 = inlined_call_operand.vmem [shape: bf16[8,36], index: 1, kind: input, shape index: {}]   ;;  %s746_s2 = inlined_call_operand.vmem [shape: bf16[8,256], index: 2, kind: output, shape index: {0}]   ;;  %s747_s3 = inlined_call_operand.vmem [shape: f32[2,8,1], index: 3, kind: output, shape index: {1}]   ;;  %s748_s4 = inlined_call_operand.vmem [shape: f32[2,8,1], index: 4, kind: output, shape index: {2}]  }
   0x1   :  { %s669_s17 = smov 0   ;;  %s671_s18 = smov 0  }
   0x2   :  { %s673_s19 = smov 0  }
   0x3 LB: > { %s27_s20 = sadd.s32 1, %s632_s18  ;;  %p43_p1 = scmp.ne.s32.totalorder %s624_s16, %s620_s15  ;;  %s636_s19 = sphi %s673_s19, %s15_s19   ;;  %s632_s18 = sphi %s671_s18, %s752_s18   ;;  %s628_s17 = sphi %s669_s17, %s751_s17   ;;  %s624_s16 = sphi %s667_s16, %s750_s16   ;;  %s620_s15 = sphi %s665_s15, %s749_s15  }
   0x4   : > { %p29_p0 = scmp.ge.s32.totalorder %s27_s20, 2  ;;  %p44_p2 = scmp.eq.s32.totalorder %s636_s19, 0 }
   0x5   : > { %s36_s22 = sadd.s32 1, %s624_s16  ;;  %p525_p5 = scmp.ge.s32.totalorder %s636_s19, 2 }
   0x6   : > { %s754_s20 = smov (%p29_p0, %s27_s20), 0  ;;  %p45_p3 = por %p44_p2, %p43_p1 }
   0x7   : > { %s33_s21 = ssub.s32 %s632_s18, %s754_s20  ;;  %173 = sbr.rel (%p525_p5) target bundleno = 20 (0x14), region = 20 }
   0x8   : > { %p34_p4 = scmp.eq.s32.totalorder %s33_s21, 0 }
   0xa   : > { %s700_s23 = scalar_select %p34_p4, %s624_s16, %s36_s22  }
   0xc   : > { %176 = sbr.rel (!%p45_p3) target bundleno = 20 (0x14), region = 24  ;;  %s178_s24 = sand.u32 (%p45_p3), 1, %s624_s16  }
   0xd   : > { %s526_s25 = sshll.u32 (%p45_p3), %s632_s18, 2  ;;  %s551_s26 = smul.u32 (%p45_p3), 20, %s178_s24 }
   0xe   : > { %s183_s29 = scalar_lea.vmem (%p45_p3), %s744_s0, %s526_s25 }
   0xf   : > { %v200_v0 = vld [vmem:[%s183_s29] sm:$0xf] (%p45_p3)  ;;  %v202_v1 = vld [vmem:[%s183_s29 + $0x8] sm:$0xf] (%p45_p3)  ;;  %v204_v2 = vld [vmem:[%s183_s29 + $0x10] sm:$0xf] (%p45_p3) }
  0x10   : > { %v206_v3 = vld [vmem:[%s183_s29 + $0x18] sm:$0xf] (%p45_p3)  ;;  %v208_v4 = vld [vmem:[%s183_s29 + $0x20] sm:$0xf] (%p45_p3)  ;;  %s180_s30 = scalar_lea.vmem (%p45_p3), [#allocation2], %s551_s26 }
  0x11   : > { %201 = vst [vmem:[%s180_s30] sm:$0xf] %v200_v0  ;;  %203 = vst [vmem:[%s180_s30 + $0x4] sm:$0xf] %v202_v1 }
  0x12   : > { %205 = vst [vmem:[%s180_s30 + $0x8] sm:$0xf] %v204_v2  ;;  %207 = vst [vmem:[%s180_s30 + $0xc] sm:$0xf] %v206_v3 }
  0x13   : > { %209 = vst [vmem:[%s180_s30 + $0x10] sm:$0xf] %v208_v4 }
  0x14 PF: > { %p527_p6 = scmp.ge.s32.totalorder %s636_s19, 1  ;;  %p242_p7 = scmp.lt.s32.totalorder %s636_s19, 3 }
  0x16   : > { %p243_p8 = pnand %p527_p6, %p242_p7 }
  0x17   : > { %s249_s5 = sand.u32 (!%p243_p8), 1, %s620_s15   ;;  %p284_p9 = scmp.lt.s32.totalorder (!%p243_p8), %s628_s17, 1 }
  0x18   : > { %246 = sbr.rel (%p243_p8) target bundleno = 380 (0x17c), region = 65 }
  0x19   : > { %s552_s6 = smul.u32 (!%p243_p8), 20, %s249_s5 }
  0x1b   : > { %s251_s7 = scalar_lea.vmem (!%p243_p8), [#allocation2], %s552_s6 }
  0x1d   : > { %v638_v5 = vmov 0.0   ;;  %vm639_vm0 = vmmov 0   ;;  %vm323_vm1 = vcmask 1041408   ;;  %v595_v6 = vld [vmem:[%s251_s7 + $0x10] ss:$0 sps:$4 sm:$0x33]  }
  0x1e   : > { %541 = vmatprep.subr.bf16.mxu0 %v638_v5  ;;  %547 = vmatprep.mubr.msk.bf16.mxu0 %vm639_vm0, %v638_v5  ;;  %v325_v7 = vsel %vm323_vm1, %v595_v6, 0  ;;  %v596_v8 = vld [vmem:[%s251_s7 + $0x8] sm:$0xff]   ;;  %v597_v9 = vld [vmem:[%s251_s7] sm:$0xff]   ;;  %vm319_vm2 = vcmask 293888   ;;  %s756_s17 = smov (!%p284_p9, %s628_s17), 1  ;;  %vm373_vm3 = vcmask 7168  }
  0x1f   : > { %542 = vmatpush3.bf16.msra.mxu0 %v325_v7  ;;  %v298_v10 = vld [vmem:[%s745_s1] sm:$0xf]  ;;  %s529_s10 = sshll.u32 %s756_s17, 3  ;;  %s528_s14 = sshll.u32 %s756_s17, 2 }
  0x20   : > { %543 = vmatprep.subr.bf16.mxu0 %v638_v5  ;;  %s292_s13 = scalar_lea.vmem %s747_s3, %s529_s10  ;;  %s287_s22 = scalar_lea.vmem %s746_s2, %s528_s14 }
  0x21   : > { %374 = vst.msk [vmem:[%s292_s13] sm:$0xff] %vm373_vm3, %v638_v5  ;;  %s296_s26 = scalar_lea.vmem %s748_s4, %s529_s10 }
  0x22   : > { %375 = vst.msk [vmem:[%s296_s26] sm:$0xff] %vm373_vm3, %v638_v5 }
  0x23   : > { %544 = vmatpush3.bf16.msra.mxu0 %v596_v8 }
  0x24   : > { %545 = vmatprep.subr.bf16.mxu0 %v638_v5 }
  0x27   : > { %546 = vmatpush3.bf16.msra.mxu0 %v597_v9 }
  0x28   : > { %v376_v17 = vld [vmem:[%s292_s13] sm:$0xff] }
  0x29   : > { %v382_v20 = vld [vmem:[%s296_s26] sm:$0xff] }
  0x2a   : > { %548 = vmatmul.mubr.msk.bf16.vlgmr.msra.gmra.mxu0 %vm319_vm2, %v298_v10 }
  0xea   : > { %v361_v11 = vpop.f32.mrf.mxu0 }
  0xeb   : > { %v367_v12 = vpack.c.bf16 %v361_v11, %v361_v11  ;;  %377 = vadd.xlane.f32.xlu0 %v361_v11  ;;  %v383_v14 = vmul.f32 %v361_v11, %v361_v11 }
  0xec   : > { %v549_v13 = vpop.f32.mrf.mxu0 }
  0xed   : > { %368 = vst [vmem:[%s287_s22] sm:$0xf] %v367_v12 }
  0xee   : > { %v364_v15 = vpop.f32.mrf.mxu0 }
  0xef   : > { %384 = vadd.xlane.f32.xlu0 %v383_v14 }
  0xf0   : > { %v550_v16 = vpop.f32.mrf.mxu0 }
 0x174   : > { %v378_v18 = vpop.xlane.xlu0 %377 }
 0x175   : > { %v379_v19 = vadd.f32 %v378_v18, %v376_v17 }
 0x177   : > { %381 = vst.msk [vmem:[%s292_s13] sm:$0xff] %vm373_vm3, %v379_v19 }
 0x178   : > { %v385_v21 = vpop.xlane.xlu0 %384 }
 0x179   : > { %v386_v22 = vadd.f32 %v385_v21, %v382_v20 }
 0x17b   : > { %387 = vst.msk [vmem:[%s296_s26] sm:$0xff] %vm373_vm3, %v386_v22 }
 0x17c PF: > { %s15_s19 = sadd.s32 1, %s636_s19   ;;  %s749_s15 = smov %s624_s16 }
 0x17d   : > { %p12_p10 = scmp.ge.s32.totalorder %s15_s19, 4   ;;  %s750_s16 = smov %s700_s23 }
 0x17e   : > { %s751_s17 = smov %s632_s18  ;;  %s752_s18 = smov %s754_s20 }
 0x17f   :  { %14 = sbr.rel (!%p12_p10) target bundleno = 3 (0x3), region = 132 }

</bundles_post_ra>
